<compile_context>
chip_gen: v5e
topology: v5e:2x2
jax: 0.10.0
libtpu: 0.0.40
codegen_flags: <defaults>
</compile_context>

<pallas_src>
import functools

import jax
import jax.numpy as jnp
from jax.experimental import pallas as pl
from jax.experimental.pallas import tpu as pltpu


def _psaa5_pool_kernel(x_ref, w_ref, b_ref, o_ref, acc_ref, *, rem):
    # x_ref:   (1, C_in, TILE_HW)   current spatial tile of one batch element
    # w_ref:   (C_out, C_in)        1x1 conv weight with BN scale and 1/(H*W) folded in (f32)
    # b_ref:   (C_out, 1)           folded BN bias (column, f32)
    # o_ref:   (1, C_out, 1)        pooled -> conv -> BN -> ReLU result
    # acc_ref: (C_in, 1) f32        running spatial-sum accumulator (scratch)
    # rem:     static int; H*W % TILE_HW (0 => no ragged last tile, no mask emitted)
    s = pl.program_id(1)
    nt = pl.num_programs(1)

    @pl.when(s == 0)
    def _init():
        acc_ref[...] = jnp.zeros_like(acc_ref)

    x = x_ref[0].astype(jnp.float32)  # (C_in, TILE_HW)

    if rem:
        # Ragged spatial size: only the LAST tile contains out-of-bounds (undefined)
        # lanes; mask them with a select (safe even if the padding is NaN/Inf).
        @pl.when(s < nt - 1)
        def _full_tile():
            acc_ref[...] += jnp.sum(x, axis=-1, keepdims=True)

        @pl.when(s == nt - 1)
        def _ragged_tile():
            lane = jax.lax.broadcasted_iota(jnp.int32, x.shape, dimension=1)
            acc_ref[...] += jnp.sum(jnp.where(lane < rem, x, 0.0),
                                    axis=-1, keepdims=True)
    else:
        acc_ref[...] += jnp.sum(x, axis=-1, keepdims=True)

    @pl.when(s == nt - 1)
    def _finalize():
        # Single tiny MXU matmul in column layout (no transposes).  The average
        # normalization and BN scale are already folded into w_ref.
        y = jnp.dot(w_ref[...], acc_ref[...], preferred_element_type=jnp.float32)  # (C_out, 1)
        y = jnp.maximum(y + b_ref[...], 0.0)
        o_ref[0] = y.astype(o_ref.dtype)


def psaa5_pooling(x, conv_w, gamma, beta, running_mean, running_var, eps=1e-5,
                  tile_hw_bytes=4 * 1024 * 1024, max_tile_hw=16384):
    """x: (N, C_in, H, W) NCHW; conv_w: (C_out, C_in, 1, 1)."""
    n, cin, h, w = x.shape
    cout = conv_w.shape[0]
    hw = h * w

    # Fold BatchNorm (eval mode) AND the 1/(H*W) average into the 1x1-conv weight;
    # fold the BN shift into a column bias.  Kernel then only does sum -> matmul -> relu.
    scale = gamma / jnp.sqrt(running_var + eps)                                    # (C_out,)
    w_folded = (conv_w.reshape(cout, cin) * scale[:, None]
                * (1.0 / float(hw))).astype(jnp.float32)                           # (C_out, C_in)
    b_folded = (beta - running_mean * scale).reshape(cout, 1).astype(jnp.float32)  # (C_out, 1)

    # Lane-dense spatial tiling.  VMEM ≈ 2 * tile bytes (double-buffered input) + tiny
    # accumulator, so a ~4 MiB tile fits the scoped-VMEM default on v5e/v6e/v7x alike.
    LANE = 128
    itemsize = jnp.dtype(x.dtype).itemsize
    tile_hw = max(LANE, (tile_hw_bytes // max(1, cin * itemsize)) // LANE * LANE)
    tile_hw = min(tile_hw, max_tile_hw)
    hw_lane = -(-hw // LANE) * LANE
    tile_hw = min(tile_hw, hw_lane)
    num_tiles = -(-hw // tile_hw)
    rem = hw % tile_hw  # static; >0 => last spatial tile is ragged and masked in-kernel

    # Contiguous reshape (free, no copy).  No padding copy of the full tensor anymore.
    x_flat = x.reshape(n, cin, hw)

    kernel = functools.partial(_psaa5_pool_kernel, rem=rem)

    pooled = pl.pallas_call(
        kernel,
        out_shape=jax.ShapeDtypeStruct((n, cout, 1), x.dtype),
        grid_spec=pltpu.PrefetchScalarGridSpec(
            num_scalar_prefetch=0,
            grid=(n, num_tiles),
            in_specs=[
                pl.BlockSpec((1, cin, tile_hw), lambda b, s: (b, 0, s)),  # x tiles
                pl.BlockSpec((cout, cin), lambda b, s: (0, 0)),           # folded weight
                pl.BlockSpec((cout, 1), lambda b, s: (0, 0)),             # folded bias
            ],
            out_specs=pl.BlockSpec((1, cout, 1), lambda b, s: (b, 0, 0)),
            scratch_shapes=[pltpu.VMEM((cin, 1), jnp.float32)],
        ),
        compiler_params=pltpu.CompilerParams(
            dimension_semantics=("parallel", "arbitrary"),
        ),
    )(x_flat, w_folded, b_folded)

    # Spatial expand outside the kernel: pure broadcast, no new information — let XLA
    # fuse it into the consumer instead of materializing N*C_out*H*W in the kernel.
    return jnp.broadcast_to(pooled[:, :, :, None], (n, cout, h, w))


def psaa5_pooling_ref(x, conv_w, gamma, beta, running_mean, running_var, eps=1e-5):
    n, cin, h, w = x.shape
    cout = conv_w.shape[0]
    pooled = jnp.mean(x.astype(jnp.float32), axis=(2, 3))                 # (N, C_in)
    y = pooled @ conv_w.reshape(cout, cin).T.astype(jnp.float32)          # (N, C_out)
    y = (y - running_mean) / jnp.sqrt(running_var + eps) * gamma + beta
    y = jax.nn.relu(y)
    return jnp.broadcast_to(y[:, :, None, None], (n, cout, h, w)).astype(x.dtype)


if __name__ == "__main__":
    key = jax.random.PRNGKey(0)
    k_x, k_w, k_g, k_b = jax.random.split(key, 4)

    # Small shapes consistent with the module's forward: x is NCHW.
    N, C_IN, C_OUT, H, W = 2, 4, 4, 16, 16

    x = jax.random.normal(k_x, (N, C_IN, H, W), dtype=jnp.float32)
    conv_w = jax.random.normal(k_w, (C_OUT, C_IN, 1, 1), dtype=jnp.float32) * 0.1
    gamma = 1.0 + 0.1 * jax.random.normal(k_g, (C_OUT,), dtype=jnp.float32)
    beta = 0.1 * jax.random.normal(k_b, (C_OUT,), dtype=jnp.float32)
    running_mean = jnp.zeros((C_OUT,), dtype=jnp.float32)
    running_var = jnp.ones((C_OUT,), dtype=jnp.float32)

    out = psaa5_pooling(x, conv_w, gamma, beta, running_mean, running_var)
    out = jax.block_until_ready(out)
    ref = psaa5_pooling_ref(x, conv_w, gamma, beta, running_mean, running_var)
    assert out.shape == (N, C_OUT, H, W)
    assert jnp.allclose(out, ref, atol=1e-5, rtol=1e-5), "mismatch vs reference (single tile)"

    # Second case exercises the multi-tile spatial reduction + in-kernel ragged-mask path
    # (H*W=400 is not a multiple of 128; max_tile_hw=128 forces 4 spatial tiles, rem=16).
    N2, C_IN2, C_OUT2, H2, W2 = 2, 8, 8, 20, 20
    k_x2, k_w2 = jax.random.split(k_x, 2)
    x2 = jax.random.normal(k_x2, (N2, C_IN2, H2, W2), dtype=jnp.float32)
    conv_w2 = jax.random.normal(k_w2, (C_OUT2, C_IN2, 1, 1), dtype=jnp.float32) * 0.1
    gamma2 = jnp.ones((C_OUT2,), dtype=jnp.float32) * 1.1
    beta2 = jnp.ones((C_OUT2,), dtype=jnp.float32) * 0.05
    mean2 = jnp.zeros((C_OUT2,), dtype=jnp.float32)
    var2 = jnp.ones((C_OUT2,), dtype=jnp.float32) * 0.9

    out2 = psaa5_pooling(x2, conv_w2, gamma2, beta2, mean2, var2, max_tile_hw=128)
    out2 = jax.block_until_ready(out2)
    ref2 = psaa5_pooling_ref(x2, conv_w2, gamma2, beta2, mean2, var2)
    assert jnp.allclose(out2, ref2, atol=1e-5, rtol=1e-5), "mismatch vs reference (multi tile)"

    print("KERNEL_OK")
</pallas_src>

<mosaic_0001>
module attributes {stable_mosaic.version = 11 : i64} {
  func.func @_psaa5_pool_kernel(%arg0: i32, %arg1: i32, %arg2: memref<1x4x256xf32, #tpu.memory_space<vmem>>, %arg3: memref<4x4xf32, #tpu.memory_space<vmem>>, %arg4: memref<4x1xf32, #tpu.memory_space<vmem>>, %arg5: memref<1x4x1xf32, #tpu.memory_space<vmem>>, %arg6: memref<4x1xf32, #tpu.memory_space<vmem>>) attributes {dimension_semantics = [#tpu.dimension_semantics<parallel>, #tpu.dimension_semantics<arbitrary>], iteration_bounds = array<i64: 2, 1>, scalar_prefetch = 0 : i64, scratch_operands = 1 : i64, tpu.core_type = #tpu.core_type<tc>, window_params = [{transform_indices = @transform_0, window_bounds = array<i64: 1, 4, 256>}, {pipeline_mode = #tpu.pipeline_mode<synchronous>, transform_indices = @transform_1, window_bounds = array<i64: 4, 4>}, {pipeline_mode = #tpu.pipeline_mode<synchronous>, transform_indices = @transform_2, window_bounds = array<i64: 4, 1>}, {transform_indices = @transform_3, window_bounds = array<i64: 1, 4, 1>}]} {
    %c0_i32 = arith.constant 0 : i32
    %0 = arith.cmpi eq, %arg1, %c0_i32 : i32
    %1 = arith.extui %0 : i1 to i32
    %c0_i32_0 = arith.constant 0 : i32
    %2 = arith.cmpi ne, %1, %c0_i32_0 : i32
    scf.if %2 {
      %cst_9 = arith.constant 0.000000e+00 : f32
      %13 = vector.broadcast %cst_9 : f32 to vector<4x1xf32>
      %c0_10 = arith.constant 0 : index
      %c0_11 = arith.constant 0 : index
      %14 = vector.load %arg6[%c0_10, %c0_11] : memref<4x1xf32, #tpu.memory_space<vmem>>, vector<4x1xf32>
      tpu.vector_store %arg6[%c0_10, %c0_11], %13 {strides = array<i32>} : memref<4x1xf32, #tpu.memory_space<vmem>>, vector<4x1xf32>,
    } else {
    }
    %c0 = arith.constant 0 : index
    %c0_1 = arith.constant 0 : index
    %c0_2 = arith.constant 0 : index
    %3 = vector.load %arg2[%c0, %c0_1, %c0_2] : memref<1x4x256xf32, #tpu.memory_space<vmem>>, vector<1x4x256xf32>
    %4 = vector.shape_cast %3 : vector<1x4x256xf32> to vector<4x256xf32>
    %c0_3 = arith.constant 0 : index
    %c0_4 = arith.constant 0 : index
    %5 = vector.load %arg6[%c0_3, %c0_4] : memref<4x1xf32, #tpu.memory_space<vmem>>, vector<4x1xf32>
    %cst = arith.constant dense<0.000000e+00> : vector<4xf32>
    %6 = vector.multi_reduction <add>, %4, %cst [1] : vector<4x256xf32> to vector<4xf32>
    %7 = vector.shape_cast %6 : vector<4xf32> to vector<4x1xf32>
    %8 = arith.addf %5, %7 : vector<4x1xf32>
    %c0_5 = arith.constant 0 : index
    %c0_6 = arith.constant 0 : index
    %9 = vector.load %arg6[%c0_5, %c0_6] : memref<4x1xf32, #tpu.memory_space<vmem>>, vector<4x1xf32>
    tpu.vector_store %arg6[%c0_5, %c0_6], %8 {strides = array<i32>} : memref<4x1xf32, #tpu.memory_space<vmem>>, vector<4x1xf32>,
    %c0_i32_7 = arith.constant 0 : i32
    %10 = arith.cmpi eq, %arg1, %c0_i32_7 : i32
    %11 = arith.extui %10 : i1 to i32
    %c0_i32_8 = arith.constant 0 : i32
    %12 = arith.cmpi ne, %11, %c0_i32_8 : i32
    scf.if %12 {
      %c0_9 = arith.constant 0 : index
      %c0_10 = arith.constant 0 : index
      %13 = vector.load %arg3[%c0_9, %c0_10] : memref<4x4xf32, #tpu.memory_space<vmem>>, vector<4x4xf32>
      %c0_11 = arith.constant 0 : index
      %c0_12 = arith.constant 0 : index
      %14 = vector.load %arg6[%c0_11, %c0_12] : memref<4x1xf32, #tpu.memory_space<vmem>>, vector<4x1xf32>
      %cst_13 = arith.constant dense<0.000000e+00> : vector<4x1xf32>
      %15 = tpu.matmul %13, %14, %cst_13 {dimension_numbers = #tpu.dot_dimension_numbers<[1], [0], [0], [1], [0, 0, 1, 1], [], []>} : vector<4x4xf32>, vector<4x1xf32>, vector<4x1xf32> -> vector<4x1xf32>
      %c0_14 = arith.constant 0 : index
      %c0_15 = arith.constant 0 : index
      %16 = vector.load %arg4[%c0_14, %c0_15] : memref<4x1xf32, #tpu.memory_space<vmem>>, vector<4x1xf32>
      %17 = arith.addf %15, %16 : vector<4x1xf32>
      %cst_16 = arith.constant 0.000000e+00 : f32
      %18 = vector.broadcast %cst_16 : f32 to vector<4x1xf32>
      %19 = arith.maximumf %17, %18 : vector<4x1xf32>
      %c0_17 = arith.constant 0 : index
      %c0_18 = arith.constant 0 : index
      %c0_19 = arith.constant 0 : index
      %20 = vector.load %arg5[%c0_17, %c0_18, %c0_19] : memref<1x4x1xf32, #tpu.memory_space<vmem>>, vector<1x4x1xf32>
      %21 = vector.shape_cast %20 : vector<1x4x1xf32> to vector<4x1xf32>
      %22 = vector.shape_cast %19 : vector<4x1xf32> to vector<1x4x1xf32>
      tpu.vector_store %arg5[%c0_17, %c0_18, %c0_19], %22 {strides = array<i32>} : memref<1x4x1xf32, #tpu.memory_space<vmem>>, vector<1x4x1xf32>,
    } else {
    }
    return
  }
  func.func @transform_0(%arg0: i32, %arg1: i32) -> (i32, i32, i32) {
    %c0_i32 = arith.constant 0 : i32
    %c0_i32_0 = arith.constant 0 : i32
    return %arg0, %c0_i32, %arg1 : i32, i32, i32
  }
  func.func @transform_1(%arg0: i32, %arg1: i32) -> (i32, i32) {
    %c0_i32 = arith.constant 0 : i32
    %c0_i32_0 = arith.constant 0 : i32
    %c0_i32_1 = arith.constant 0 : i32
    return %c0_i32, %c0_i32_0 : i32, i32
  }
  func.func @transform_2(%arg0: i32, %arg1: i32) -> (i32, i32) {
    %c0_i32 = arith.constant 0 : i32
    %c0_i32_0 = arith.constant 0 : i32
    %c0_i32_1 = arith.constant 0 : i32
    return %c0_i32, %c0_i32_0 : i32, i32
  }
  func.func @transform_3(%arg0: i32, %arg1: i32) -> (i32, i32, i32) {
    %c0_i32 = arith.constant 0 : i32
    %c0_i32_0 = arith.constant 0 : i32
    %c0_i32_1 = arith.constant 0 : i32
    return %arg0, %c0_i32, %c0_i32_0 : i32, i32, i32
  }
}

</mosaic_0001>

<bundles_post_ra>
// kernel: tpu_custom_call.1
= control target key start
LH: loop header
LB: loop body
LE: loop exit
PB: predicated region body
PF: predicated region fallthrough
CT: control target
= control target key end

     0   :  { %8 = vsyncpa [#allocation4], 0  ;;  %s611_s0 = inlined_call_operand.hbm [shape: f32[2,4,256], index: 0, kind: input, shape index: {}]   ;;  %s612_s1 = inlined_call_operand.vmem [shape: f32[4,4], index: 1, kind: input, shape index: {}]   ;;  %s613_s2 = inlined_call_operand.vmem [shape: f32[4,1], index: 2, kind: input, shape index: {}]   ;;  %s614_s3 = inlined_call_operand.vmem [shape: f32[2,4,1], index: 3, kind: output, shape index: {}]  }
   0x1   :  { %10 = vsyncpa [#allocation4 + $0x1], 0  ;;  %s514_s12 = smov 0   ;;  %s516_s13 = smov 0  }
   0x2   :  { %s518_s14 = smov 0   ;;  %s520_s15 = smov 0  }
   0x3   :  { %s522_s16 = smov 0   ;;  %s524_s17 = smov 0  }
   0x4 LB: > { %s340_s18 = sadd.s32 4294967295, %s491_s17   ;;  %s28_s19 = sadd.s32 1, %s487_s16  ;;  %s491_s17 = sphi %s524_s17, %s16_s17   ;;  %s487_s16 = sphi %s522_s16, %s621_s16   ;;  %s483_s15 = sphi %s520_s15, %s620_s15   ;;  %s479_s14 = sphi %s518_s14, %s619_s14   ;;  %s475_s13 = sphi %s516_s13, %s618_s13   ;;  %s471_s12 = sphi %s514_s12, %s617_s12  }
   0x5   : > { %p30_p0 = scmp.ge.s32.totalorder %s28_s19, 2  ;;  %s37_s20 = sadd.s32 1, %s479_s14 }
   0x6   : > { %p44_p1 = scmp.ne.s32.totalorder %s479_s14, %s475_s13  ;;  %p45_p2 = scmp.eq.s32.totalorder %s491_s17, 0 }
   0x7   : > { %s623_s19 = smov (%p30_p0, %s28_s19), 0  ;;  %p50_p4 = scmp.ne.s32.totalorder %s475_s13, %s471_s12 }
   0x8   : > { %p550_p3 = por %p45_p2, %p44_p1  ;;  %s32_s22 = ssub.s32 %s487_s16, %s623_s19 }
   0x9   : > { %p51_p5 = scmp.eq.s32.totalorder %s340_s18, 0  ;;  %p35_p6 = scmp.eq.s32.totalorder %s32_s22, 0 }
   0xa   : > { %p361_p8 = scmp.lt.s32.totalorder %s491_s17, 2  ;;  %s148_s25 = sand.u32 1, %s479_s14  }
   0xb   : > { %p557_p7 = por %p51_p5, %p50_p4  ;;  %s354_s26 = sshll.u32 %s487_s16, 3 }
   0xc   : > { %s563_s24 = scalar_select %p35_p6, %s479_s14, %s37_s20  }
   0xd   : > { %s344_s27 = sshll.u32 %s148_s25, 3  ;;  %s159_s30 = scalar_lea.hbm %s611_s0, %s354_s26 }
   0xe   : > { %s161_s4 = sshll.u32 %s159_s30, 4  ;;  %s152_s5 = scalar_lea.vmem [#allocation3], %s344_s27  ;;  %s162_s4 = int_to_ptr.hbm [resolvable:$true] %s161_s4 }
   0xf   : > { %s163_s6 = sshll.u32 %s152_s5, 4  ;;  %p358_p9 = pnand %p361_p8, %p550_p3  ;;  %s164_s6 = int_to_ptr.vmem [resolvable:$true] %s163_s6 }
  0x10   : > { %p347_p10 = scmp.ge.s32.totalorder %s491_s17, 1  ;;  %p168_p11 = scmp.lt.s32.totalorder %s491_s17, 3 }
  0x11   : > { %s149_s7 = scalar_lea.sflag [#allocation4], %s148_s25 }
  0x12   : > { %360 = dma.hbm_to_vmem [thread:$0]  (!%p358_p9), %s162_s4, 128, %s164_s6, %s149_s7  }
  0x13   : > { %p169_p12 = pnand %p347_p10, %p168_p11 }
  0x14   : > { %s174_s8 = sand.u32 (!%p169_p12), 1, %s475_s13  }
  0x15   : > { %172 = sbr.rel (%p169_p12) target bundleno = 298 (0x12a), region = 32  ;;  %s348_s9 = sshll.u32 (!%p169_p12), %s174_s8, 3 }
  0x16   : > { %s175_s10 = scalar_lea.sflag (!%p169_p12), [#allocation4], %s174_s8  ;;  %s178_s11 = scalar_lea.vmem (!%p169_p12), [#allocation3], %s348_s9 }
  0x1a   : > { %466 = dma.done.wait (%p557_p7), %s175_s10, 128  }
  0x1b   : > { %468 = vsyncadd (%p557_p7), %s175_s10, 4294967168  ;;  %vm210_vm0 = vcmask 3072   ;;  %v493_v0 = vmov 0.0   ;;  %v212_v1 = vld [vmem:[%s178_s11] sm:$0xff]  ;;  %vm220_vm1 = vcmask 1043456   ;;  %vm235_vm2 = vcmask 31744  }
  0x1c   : > { %211 = vst.msk [vmem:[#allocation2] sm:$0xf] %vm210_vm0, %v493_v0  ;;  %v232_v10 = vld [vmem:[%s612_s1] sm:$0xf]  ;;  %p202_p13 = scmp.lt.s32.totalorder %s483_s15, 1 }
  0x1d   : > { %215 = vst [vmem:[#allocation1] ss:$2 sm:$0xff] %v212_v1  ;;  %v234_v12 = vld [vmem:[%s613_s2] sm:$0xf] }
  0x1e   : > { %s625_s15 = smov (!%p202_p13, %s483_s15), 1 }
  0x1f   : > { %s349_s22 = sshll.u32 %s625_s15, 2 }
  0x20   : > { %s205_s26 = scalar_lea.vmem %s614_s3, %s349_s22 }
  0x23   : > { %v213_v7 = vld [vmem:[#allocation2] sm:$0xf] }
  0x24   : > { %v216_v2 = vld.sshfl [vmem:[#allocation1] sm:$0xff pattern:$0x75316420]  ;;  %v217_v3 = vld.sshfl [vmem:[#allocation1 + $0x8] sm:$0xff pattern:$0x75316420] }
  0x25   : > { %v221_v4 = vsel %vm220_vm1, %v216_v2, 0.0  ;;  %v222_v5 = vsel %vm220_vm1, %v217_v3, 0.0 }
  0x26   : > { %v223_v6 = vadd.f32 %v222_v5, %v221_v4 }
  0x28   : > { %224 = vadd.xlane.f32.xlu0 %v223_v6 }
  0x9b   : > { %v225_v8 = vpop.xlane.xlu0 %224 }
  0x9c   : > { %v226_v9 = vadd.f32 %v225_v8, %v213_v7 }
  0x9e   : > { %228 = vst.msk [vmem:[#allocation2] sm:$0xf] %vm210_vm0, %v226_v9 }
  0xa5   : > { %v233_v11 = vld [vmem:[#allocation2] sm:$0xf] }
  0xa6   : > { %350 = vmatpush.msk.msra.mxu0 %vm220_vm1, %v233_v11 }
  0xa7   : > { %351 = vmatmul.msk.f32.vlgmr.msra.gmra.mxu0 %vm235_vm2, %v232_v10 }
 0x124   : > { %v259_v13 = vpop.f32.mrf.mxu0 }
 0x125   : > { %v260_v14 = vadd.f32 %v259_v13, %v234_v12 }
 0x127   : > { %v262_v15 = vmax.f32 %v260_v14, 0.0 }
 0x129   : > { %263 = vst.msk [vmem:[%s205_s26] sm:$0xf] %vm210_vm0, %v262_v15 }
 0x12a PF: > { %s16_s17 = sadd.s32 1, %s491_s17   ;;  %s617_s12 = smov %s475_s13 }
 0x12b   : > { %p13_p0 = scmp.ge.s32.totalorder %s16_s17, 4   ;;  %s618_s13 = smov %s479_s14 }
 0x12c   : > { %s619_s14 = smov %s563_s24  ;;  %s620_s15 = smov %s487_s16 }
 0x12d   : > { %s621_s16 = smov %s623_s19  ;;  %15 = sbr.rel (!%p13_p0) target bundleno = 4 (0x4), region = 80 }
 0x132   :  { %283 = vsyncpa [#allocation4], 1 }
 0x133   :  { %285 = vsyncpa [#allocation4 + $0x1], 1 }

</bundles_post_ra>
